<compile_context>
chip_gen: v5e
topology: v5e:2x2
jax: 0.10.0
libtpu: 0.0.40
codegen_flags: <defaults>
</compile_context>

<pallas_src>
import jax
import jax.numpy as jnp
from jax.experimental import pallas as pl
from jax.experimental.pallas import tpu as pltpu


def _cdiv(a: int, b: int) -> int:
    return (a + b - 1) // b


def basic_block_kernel(x_ref, w1_ref, b1_ref, w2_ref, b2_ref, o_ref):
    x = x_ref[...]          # (TB, P)  f32 (kept f32 for the residual path)
    w1 = w1_ref[...]        # (P, P)   pre-transposed (in, out), f32 or bf16
    w2 = w2_ref[...]        # (P, P)
    b1 = b1_ref[...]        # (1, P)   f32
    b2 = b2_ref[...]        # (1, P)   f32

    # Linear1 on the MXU: plain x @ W1t (no in-kernel transpose), f32 accumulate.
    h = jnp.dot(x.astype(w1.dtype), w1, preferred_element_type=jnp.float32)
    h = jnp.maximum(h + b1, 0.0)                     # bias + ReLU in f32 (VPU)

    # Linear2 + residual + ReLU, all elementwise work in f32.
    out = jnp.dot(h.astype(w2.dtype), w2, preferred_element_type=jnp.float32)
    out = jnp.maximum(out + b2 + x, 0.0)

    o_ref[...] = out.astype(o_ref.dtype)


def basic_block(x, w1, b1, w2, b2, *, tile_b=256, mxu_dtype=None):
    """x: (B, P); w1,w2: (P, P) PyTorch (out,in); b1,b2: (P,)."""
    B, P = x.shape
    out_dtype = x.dtype
    if mxu_dtype is None:
        mxu_dtype = x.dtype

    # Lane-dense feature dim: pad planes up to a multiple of 128.
    P_pad = max(128, _cdiv(P, 128) * 128)

    # Batch tile: multiple of 8 sublanes, at most tile_b, at most padded batch.
    B8 = _cdiv(B, 8) * 8
    tb = max(8, (min(tile_b, B8) // 8) * 8)
    B_pad = _cdiv(B, tb) * tb
    grid = (B_pad // tb,)

    # One-time host/XLA-side padding and weight pre-transpose.
    xp = jnp.zeros((B_pad, P_pad), x.dtype).at[:B, :P].set(x)
    w1t = jnp.zeros((P_pad, P_pad), mxu_dtype).at[:P, :P].set(w1.T.astype(mxu_dtype))
    w2t = jnp.zeros((P_pad, P_pad), mxu_dtype).at[:P, :P].set(w2.T.astype(mxu_dtype))
    b1p = jnp.zeros((1, P_pad), jnp.float32).at[0, :P].set(b1.astype(jnp.float32))
    b2p = jnp.zeros((1, P_pad), jnp.float32).at[0, :P].set(b2.astype(jnp.float32))

    # VMEM budget: double-buffered x/out tiles + resident weights + biases.
    x_itemsize = xp.dtype.itemsize
    w_itemsize = w1t.dtype.itemsize
    vmem_needed = (
        2 * 2 * tb * P_pad * x_itemsize          # x tile + out tile, double-buffered
        + 2 * 2 * P_pad * P_pad * w_itemsize     # two weights (pipeline buffers)
        + 2 * 2 * P_pad * 4                      # two biases
    )
    vmem_limit = int(min(max(vmem_needed + (4 << 20), 16 << 20), 64 << 20))

    # Scheduling hint for XLA around the custom call.
    out_bytes = B_pad * P_pad * jnp.dtype(out_dtype).itemsize
    in_bytes = sum(a.size * a.dtype.itemsize for a in (xp, w1t, w2t, b1p, b2p))
    cost = pl.CostEstimate(
        flops=2 * 2 * B_pad * P_pad * P_pad,
        transcendentals=0,
        bytes_accessed=in_bytes + out_bytes,
    )

    out_padded = pl.pallas_call(
        basic_block_kernel,
        out_shape=jax.ShapeDtypeStruct((B_pad, P_pad), out_dtype),
        grid=grid,
        in_specs=[
            pl.BlockSpec((tb, P_pad), lambda i: (i, 0)),       # x tile
            pl.BlockSpec((P_pad, P_pad), lambda i: (0, 0)),    # W1^T (resident)
            pl.BlockSpec((1, P_pad), lambda i: (0, 0)),        # b1   (resident)
            pl.BlockSpec((P_pad, P_pad), lambda i: (0, 0)),    # W2^T (resident)
            pl.BlockSpec((1, P_pad), lambda i: (0, 0)),        # b2   (resident)
        ],
        out_specs=pl.BlockSpec((tb, P_pad), lambda i: (i, 0)),
        compiler_params=pltpu.CompilerParams(
            dimension_semantics=("parallel",),   # shards across TCs on v7x
            vmem_limit_bytes=vmem_limit,
        ),
        cost_estimate=cost,
    )(xp, w1t, b1p, w2t, b2p)

    return out_padded[:B, :P]


def basic_block_ref(x, w1, b1, w2, b2):
    h = jnp.maximum(x @ w1.T + b1, 0.0)
    out = h @ w2.T + b2 + x
    return jnp.maximum(out, 0.0)


def _make_params(key, planes, batch):
    kx, kw1, kb1, kw2, kb2 = jax.random.split(key, 5)
    bound = 1.0 / (planes ** 0.5)
    x = jax.random.normal(kx, (batch, planes), dtype=jnp.float32)
    w1 = jax.random.uniform(kw1, (planes, planes), jnp.float32, -bound, bound)
    b1 = jax.random.uniform(kb1, (planes,), jnp.float32, -bound, bound)
    w2 = jax.random.uniform(kw2, (planes, planes), jnp.float32, -bound, bound)
    b2 = jax.random.uniform(kb2, (planes,), jnp.float32, -bound, bound)
    return x, w1, b1, w2, b2


if __name__ == "__main__":
    key = jax.random.PRNGKey(0)
    k1, k2 = jax.random.split(key)

    # Small case matching the module spec (planes=32).
    x, w1, b1, w2, b2 = _make_params(k1, planes=32, batch=16)
    out = jax.block_until_ready(basic_block(x, w1, b1, w2, b2))
    ref = basic_block_ref(x, w1, b1, w2, b2)
    assert out.shape == (16, 32)
    assert jnp.allclose(out, ref, atol=1e-5, rtol=1e-5), "f32 mismatch vs reference"

    # bf16-MXU-operand variant (v6e/v7x path): f32 accumulate + f32 residual.
    out_bf16 = jax.block_until_ready(
        basic_block(x, w1, b1, w2, b2, mxu_dtype=jnp.bfloat16))
    assert jnp.allclose(out_bf16, ref, atol=1e-1, rtol=1e-1), "bf16 MXU mismatch"

    # Larger, non-multiple shapes: exercises batch padding (300 -> 512, grid=2)
    # and lane padding (192 -> 256).
    x2, w1b, b1b, w2b, b2b = _make_params(k2, planes=192, batch=300)
    out2 = jax.block_until_ready(basic_block(x2, w1b, b1b, w2b, b2b, tile_b=256))
    ref2 = basic_block_ref(x2, w1b, b1b, w2b, b2b)
    assert out2.shape == (300, 192)
    assert jnp.allclose(out2, ref2, atol=1e-3, rtol=1e-3), "multi-tile mismatch"

    print("KERNEL_OK")
</pallas_src>

<mosaic_0001>
module attributes {stable_mosaic.version = 11 : i64} {
  func.func @basic_block_kernel(%arg0: i32, %arg1: memref<16x128xf32, #tpu.memory_space<vmem>>, %arg2: memref<128x128xf32, #tpu.memory_space<vmem>>, %arg3: memref<1x128xf32, #tpu.memory_space<vmem>>, %arg4: memref<128x128xf32, #tpu.memory_space<vmem>>, %arg5: memref<1x128xf32, #tpu.memory_space<vmem>>, %arg6: memref<16x128xf32, #tpu.memory_space<vmem>>) attributes {dimension_semantics = [#tpu.dimension_semantics<parallel>], iteration_bounds = array<i64: 1>, scalar_prefetch = 0 : i64, scratch_operands = 0 : i64, tpu.core_type = #tpu.core_type<tc>, window_params = [{transform_indices = @transform_0, window_bounds = array<i64: 16, 128>}, {pipeline_mode = #tpu.pipeline_mode<synchronous>, transform_indices = @transform_1, window_bounds = array<i64: 128, 128>}, {pipeline_mode = #tpu.pipeline_mode<synchronous>, transform_indices = @transform_2, window_bounds = array<i64: 1, 128>}, {pipeline_mode = #tpu.pipeline_mode<synchronous>, transform_indices = @transform_3, window_bounds = array<i64: 128, 128>}, {pipeline_mode = #tpu.pipeline_mode<synchronous>, transform_indices = @transform_4, window_bounds = array<i64: 1, 128>}, {transform_indices = @transform_5, window_bounds = array<i64: 16, 128>}]} {
    %c0 = arith.constant 0 : index
    %c0_0 = arith.constant 0 : index
    %0 = vector.load %arg1[%c0, %c0_0] : memref<16x128xf32, #tpu.memory_space<vmem>>, vector<16x128xf32>
    %c0_1 = arith.constant 0 : index
    %c0_2 = arith.constant 0 : index
    %1 = vector.load %arg2[%c0_1, %c0_2] : memref<128x128xf32, #tpu.memory_space<vmem>>, vector<128x128xf32>
    %c0_3 = arith.constant 0 : index
    %c0_4 = arith.constant 0 : index
    %2 = vector.load %arg4[%c0_3, %c0_4] : memref<128x128xf32, #tpu.memory_space<vmem>>, vector<128x128xf32>
    %c0_5 = arith.constant 0 : index
    %c0_6 = arith.constant 0 : index
    %3 = vector.load %arg3[%c0_5, %c0_6] : memref<1x128xf32, #tpu.memory_space<vmem>>, vector<1x128xf32>
    %c0_7 = arith.constant 0 : index
    %c0_8 = arith.constant 0 : index
    %4 = vector.load %arg5[%c0_7, %c0_8] : memref<1x128xf32, #tpu.memory_space<vmem>>, vector<1x128xf32>
    %cst = arith.constant dense<0.000000e+00> : vector<16x128xf32>
    %5 = tpu.matmul %0, %1, %cst {dimension_numbers = #tpu.dot_dimension_numbers<[1], [0], [0], [1], [0, 0, 1, 1], [], []>} : vector<16x128xf32>, vector<128x128xf32>, vector<16x128xf32> -> vector<16x128xf32>
    %6 = vector.broadcast %3 : vector<1x128xf32> to vector<16x128xf32>
    %7 = arith.addf %5, %6 : vector<16x128xf32>
    %cst_9 = arith.constant 0.000000e+00 : f32
    %8 = vector.broadcast %cst_9 : f32 to vector<16x128xf32>
    %9 = arith.maximumf %7, %8 : vector<16x128xf32>
    %cst_10 = arith.constant dense<0.000000e+00> : vector<16x128xf32>
    %10 = tpu.matmul %9, %2, %cst_10 {dimension_numbers = #tpu.dot_dimension_numbers<[1], [0], [0], [1], [0, 0, 1, 1], [], []>} : vector<16x128xf32>, vector<128x128xf32>, vector<16x128xf32> -> vector<16x128xf32>
    %11 = vector.broadcast %4 : vector<1x128xf32> to vector<16x128xf32>
    %12 = arith.addf %10, %11 : vector<16x128xf32>
    %13 = arith.addf %12, %0 : vector<16x128xf32>
    %cst_11 = arith.constant 0.000000e+00 : f32
    %14 = vector.broadcast %cst_11 : f32 to vector<16x128xf32>
    %15 = arith.maximumf %13, %14 : vector<16x128xf32>
    %c0_12 = arith.constant 0 : index
    %c0_13 = arith.constant 0 : index
    %16 = vector.load %arg6[%c0_12, %c0_13] : memref<16x128xf32, #tpu.memory_space<vmem>>, vector<16x128xf32>
    tpu.vector_store %arg6[%c0_12, %c0_13], %15 {strides = array<i32>} : memref<16x128xf32, #tpu.memory_space<vmem>>, vector<16x128xf32>,
    return
  }
  func.func @transform_0(%arg0: i32) -> (i32, i32) {
    %c0_i32 = arith.constant 0 : i32
    %c0_i32_0 = arith.constant 0 : i32
    return %arg0, %c0_i32 : i32, i32
  }
  func.func @transform_1(%arg0: i32) -> (i32, i32) {
    %c0_i32 = arith.constant 0 : i32
    %c0_i32_0 = arith.constant 0 : i32
    %c0_i32_1 = arith.constant 0 : i32
    return %c0_i32, %c0_i32_0 : i32, i32
  }
  func.func @transform_2(%arg0: i32) -> (i32, i32) {
    %c0_i32 = arith.constant 0 : i32
    %c0_i32_0 = arith.constant 0 : i32
    %c0_i32_1 = arith.constant 0 : i32
    return %c0_i32, %c0_i32_0 : i32, i32
  }
  func.func @transform_3(%arg0: i32) -> (i32, i32) {
    %c0_i32 = arith.constant 0 : i32
    %c0_i32_0 = arith.constant 0 : i32
    %c0_i32_1 = arith.constant 0 : i32
    return %c0_i32, %c0_i32_0 : i32, i32
  }
  func.func @transform_4(%arg0: i32) -> (i32, i32) {
    %c0_i32 = arith.constant 0 : i32
    %c0_i32_0 = arith.constant 0 : i32
    %c0_i32_1 = arith.constant 0 : i32
    return %c0_i32, %c0_i32_0 : i32, i32
  }
  func.func @transform_5(%arg0: i32) -> (i32, i32) {
    %c0_i32 = arith.constant 0 : i32
    %c0_i32_0 = arith.constant 0 : i32
    return %arg0, %c0_i32 : i32, i32
  }
}

</mosaic_0001>

<bundles_post_ra>
// kernel: tpu_custom_call.1
= control target key start
LH: loop header
LB: loop body
LE: loop exit
PB: predicated region body
PF: predicated region fallthrough
CT: control target
= control target key end

     0   :  { %10 = vsyncpa [#allocation3], 0  ;;  %s392_s0 = inlined_call_operand.hbm [shape: f32[16,128], index: 0, kind: input, shape index: {}]   ;;  %s393_s1 = inlined_call_operand.hbm [shape: f32[128,128], index: 1, kind: input, shape index: {}]   ;;  %s394_s2 = inlined_call_operand.vmem [shape: f32[1,128], index: 2, kind: input, shape index: {}]   ;;  %s395_s3 = inlined_call_operand.hbm [shape: f32[128,128], index: 3, kind: input, shape index: {}]   ;;  %s396_s4 = inlined_call_operand.vmem [shape: f32[1,128], index: 4, kind: input, shape index: {}]   ;;  %s397_s5 = inlined_call_operand.hbm [shape: f32[16,128], index: 5, kind: output, shape index: {}]  }
   0x1   :  { %11 = vsyncpa [#allocation6], 0 }
   0x2   :  { %12 = vsyncpa [#allocation4], 0  ;;  %s30_s20 = sshll.u32 %s393_s1, 4  ;;  %s326_s21 = smov [#allocation5]   ;;  %s31_s20 = int_to_ptr.hbm [resolvable:$true] %s30_s20 }
   0x3   :  { %s32_s22 = sshll.u32 %s326_s21, 4  ;;  %s17_s25 = sshll.u32 %s392_s0, 4  ;;  %s33_s22 = int_to_ptr.vmem [resolvable:$true] %s32_s22  ;;  %s18_s25 = int_to_ptr.hbm [resolvable:$true] %s17_s25 }
   0x4   :  { %s327_s26 = smov 128   ;;  %s328_s27 = smov 8  }
   0x5   :  { %38 = dma.hbm_to_vmem [thread:$0]  %s31_s20, 2048, %s33_s22, [#allocation6], %s327_s26, %s327_s26, %s328_s27  }
   0x6   :  { %s329_s28 = smov [#allocation2]   ;;  %s45_s1 = sshll.u32 %s395_s3, 4  ;;  %s46_s1 = int_to_ptr.hbm [resolvable:$true] %s45_s1 }
   0x7   :  { %s19_s29 = sshll.u32 %s329_s28, 4  ;;  %s330_s0 = smov [#allocation7]   ;;  %s20_s29 = int_to_ptr.vmem [resolvable:$true] %s19_s29 }
   0x8   :  { %25 = dma.hbm_to_vmem [thread:$0]  %s18_s25, 256, %s20_s29, [#allocation3], %s327_s26, %s327_s26, %s328_s27  }
   0x9   :  { %s47_s7 = sshll.u32 %s330_s0, 4  ;;  %s48_s7 = int_to_ptr.vmem [resolvable:$true] %s47_s7 }
   0xa   :  { %53 = dma.hbm_to_vmem [thread:$0]  %s46_s1, 2048, %s48_s7, [#allocation6], %s327_s26, %s327_s26, %s328_s27  }
   0xb   :  { %320 = dma.done.wait [#allocation3], 256  }
   0xc   :  { %321 = vsyncadd [#allocation3], 4294967040 }
   0xd   :  { %322 = dma.done.wait [#allocation6], 4096  }
   0xe   :  { %323 = vsyncadd [#allocation6], 4294963200  ;;  %v85_v0 = vld [vmem:[#allocation5 + $0x78] sm:$0xff]  ;;  %v84_v1 = vld [vmem:[#allocation5 + $0x70] sm:$0xff]  ;;  %s170_s14 = sshll.u32 %s397_s5, 4  ;;  %s171_s14 = int_to_ptr.hbm [resolvable:$true] %s170_s14 }
   0xf   :  { %184 = vmatpush.msra.mxu2 %v85_v0  ;;  %107 = vmatpush.msra.mxu0 %v85_v0  ;;  %v83_v2 = vld [vmem:[#allocation5 + $0x68] sm:$0xff]  ;;  %v82_v3 = vld [vmem:[#allocation5 + $0x60] sm:$0xff]  ;;  %v81_v4 = vld [vmem:[#allocation5 + $0x58] sm:$0xff] }
  0x10   :  { %v101_v5 = vld [vmem:[#allocation7 + $0x78] sm:$0xff]  ;;  %v100_v6 = vld [vmem:[#allocation7 + $0x70] sm:$0xff]  ;;  %v99_v8 = vld [vmem:[#allocation7 + $0x68] sm:$0xff] }
  0x11   :  { %185 = vmatpush.msra.mxu2 %v84_v1  ;;  %108 = vmatpush.msra.mxu0 %v84_v1  ;;  %v80_v7 = vld [vmem:[#allocation5 + $0x50] sm:$0xff]  ;;  %v79_v9 = vld [vmem:[#allocation5 + $0x48] sm:$0xff]  ;;  %v98_v10 = vld [vmem:[#allocation7 + $0x60] sm:$0xff] }
  0x12   :  { %200 = vmatpush.msra.mxu3 %v101_v5  ;;  %135 = vmatpush.msra.mxu1 %v101_v5  ;;  %v78_v11 = vld [vmem:[#allocation5 + $0x40] sm:$0xff]  ;;  %v97_v12 = vld [vmem:[#allocation7 + $0x58] sm:$0xff]  ;;  %v96_v14 = vld [vmem:[#allocation7 + $0x50] sm:$0xff] }
  0x13   :  { %186 = vmatpush.msra.mxu2 %v83_v2  ;;  %109 = vmatpush.msra.mxu0 %v83_v2  ;;  %v77_v13 = vld [vmem:[#allocation5 + $0x38] sm:$0xff]  ;;  %v76_v15 = vld [vmem:[#allocation5 + $0x30] sm:$0xff]  ;;  %v95_v16 = vld [vmem:[#allocation7 + $0x48] sm:$0xff] }
  0x14   :  { %201 = vmatpush.msra.mxu3 %v100_v6  ;;  %136 = vmatpush.msra.mxu1 %v100_v6  ;;  %v75_v17 = vld [vmem:[#allocation5 + $0x28] sm:$0xff]  ;;  %v94_v18 = vld [vmem:[#allocation7 + $0x40] sm:$0xff]  ;;  %v93_v20 = vld [vmem:[#allocation7 + $0x38] sm:$0xff] }
  0x15   :  { %187 = vmatpush.msra.mxu2 %v82_v3  ;;  %110 = vmatpush.msra.mxu0 %v82_v3  ;;  %v74_v19 = vld [vmem:[#allocation5 + $0x20] sm:$0xff]  ;;  %v73_v21 = vld [vmem:[#allocation5 + $0x18] sm:$0xff]  ;;  %v92_v22 = vld [vmem:[#allocation7 + $0x30] sm:$0xff] }
  0x16   :  { %202 = vmatpush.msra.mxu3 %v99_v8  ;;  %137 = vmatpush.msra.mxu1 %v99_v8  ;;  %v72_v23 = vld [vmem:[#allocation5 + $0x10] sm:$0xff]  ;;  %v91_v24 = vld [vmem:[#allocation7 + $0x28] sm:$0xff]  ;;  %v90_v26 = vld [vmem:[#allocation7 + $0x20] sm:$0xff] }
  0x17   :  { %188 = vmatpush.msra.mxu2 %v81_v4  ;;  %111 = vmatpush.msra.mxu0 %v81_v4  ;;  %v71_v25 = vld [vmem:[#allocation5 + $0x8] sm:$0xff]  ;;  %v70_v27 = vld [vmem:[#allocation5] sm:$0xff]  ;;  %v69_v28 = vld [vmem:[#allocation2 + $0x8] sm:$0xff] }
  0x18   :  { %203 = vmatpush.msra.mxu3 %v98_v10  ;;  %138 = vmatpush.msra.mxu1 %v98_v10  ;;  %v68_v29 = vld [vmem:[#allocation2] sm:$0xff]  ;;  %v89_v30 = vld [vmem:[#allocation7 + $0x18] sm:$0xff]  ;;  %v87_v32 = vld [vmem:[#allocation7 + $0x8] sm:$0xff] }
  0x19   :  { %189 = vmatpush.msra.mxu2 %v80_v7  ;;  %112 = vmatpush.msra.mxu0 %v80_v7  ;;  %v88_v31 = vld [vmem:[#allocation7 + $0x10] sm:$0xff]  ;;  %v86_v33 = vld [vmem:[#allocation7] sm:$0xff] }
  0x1a   :  { %204 = vmatpush.msra.mxu3 %v97_v12  ;;  %139 = vmatpush.msra.mxu1 %v97_v12  ;;  %v222_v34 = vld [vmem:[%s394_s2] ss:$0 sm:$0xff]  ;;  %s331_s2 = smov [#allocation8]  }
  0x1b   :  { %190 = vmatpush.msra.mxu2 %v79_v9  ;;  %113 = vmatpush.msra.mxu0 %v79_v9  ;;  %v223_v41 = vld [vmem:[%s396_s4] ss:$0 sm:$0xff]  ;;  %s168_s11 = sshll.u32 %s331_s2, 4  ;;  %s169_s11 = int_to_ptr.vmem [resolvable:$true] %s168_s11 }
  0x1c   :  { %205 = vmatpush.msra.mxu3 %v96_v14  ;;  %140 = vmatpush.msra.mxu1 %v96_v14 }
  0x1d   :  { %191 = vmatpush.msra.mxu2 %v78_v11  ;;  %114 = vmatpush.msra.mxu0 %v78_v11 }
  0x1e   :  { %206 = vmatpush.msra.mxu3 %v95_v16  ;;  %141 = vmatpush.msra.mxu1 %v95_v16 }
  0x1f   :  { %192 = vmatpush.msra.mxu2 %v77_v13  ;;  %115 = vmatpush.msra.mxu0 %v77_v13 }
  0x20   :  { %207 = vmatpush.msra.mxu3 %v94_v18  ;;  %142 = vmatpush.msra.mxu1 %v94_v18 }
  0x21   :  { %193 = vmatpush.msra.mxu2 %v76_v15  ;;  %116 = vmatpush.msra.mxu0 %v76_v15 }
  0x22   :  { %208 = vmatpush.msra.mxu3 %v93_v20  ;;  %143 = vmatpush.msra.mxu1 %v93_v20 }
  0x23   :  { %194 = vmatpush.msra.mxu2 %v75_v17  ;;  %117 = vmatpush.msra.mxu0 %v75_v17 }
  0x24   :  { %209 = vmatpush.msra.mxu3 %v92_v22  ;;  %144 = vmatpush.msra.mxu1 %v92_v22 }
  0x25   :  { %195 = vmatpush.msra.mxu2 %v74_v19  ;;  %118 = vmatpush.msra.mxu0 %v74_v19 }
  0x26   :  { %210 = vmatpush.msra.mxu3 %v91_v24  ;;  %145 = vmatpush.msra.mxu1 %v91_v24 }
  0x27   :  { %196 = vmatpush.msra.mxu2 %v73_v21  ;;  %119 = vmatpush.msra.mxu0 %v73_v21 }
  0x28   :  { %211 = vmatpush.msra.mxu3 %v90_v26  ;;  %146 = vmatpush.msra.mxu1 %v90_v26 }
  0x29   :  { %197 = vmatpush.msra.mxu2 %v72_v23  ;;  %120 = vmatpush.msra.mxu0 %v72_v23 }
  0x2a   :  { %212 = vmatpush.msra.mxu3 %v89_v30  ;;  %147 = vmatpush.msra.mxu1 %v89_v30 }
  0x2b   :  { %198 = vmatpush.msra.mxu2 %v71_v25  ;;  %121 = vmatpush.msra.mxu0 %v71_v25 }
  0x2c   :  { %213 = vmatpush.msra.mxu3 %v88_v31  ;;  %148 = vmatpush.msra.mxu1 %v88_v31 }
  0x2d   :  { %199 = vmatpush.msra.mxu2 %v70_v27  ;;  %122 = vmatpush.msra.mxu0 %v70_v27 }
  0x2e   :  { %126 = vmatmul.f32.vlgmr.msra.gmra.mxu2 %v69_v28  ;;  %123 = vmatmul.f32.vlgmr.msra.gmra.mxu0 %v68_v29 }
  0x2f   :  { %214 = vmatpush.msra.mxu3 %v87_v32  ;;  %149 = vmatpush.msra.mxu1 %v87_v32 }
  0x31   :  { %215 = vmatpush.msra.mxu3 %v86_v33  ;;  %150 = vmatpush.msra.mxu1 %v86_v33 }
  0xab   :  { %v124_v35 = vpop.f32.mrf.mxu0 }
  0xac   :  { %v125_v36 = vadd.f32 %v222_v34, %v124_v35 }
  0xae   :  { %v130_v37 = vmax.f32 %v125_v36, 0.0 }
  0xb0   :  { %151 = vmatmul.f32.vlgmr.msra.gmra.mxu1 %v130_v37 }
  0xb1   :  { %v127_v38 = vpop.f32.mrf.mxu2 }
  0xb2   :  { %v128_v39 = vadd.f32 %v222_v34, %v127_v38 }
  0xb4   :  { %v131_v40 = vmax.f32 %v128_v39, 0.0 }
  0xb6   :  { %154 = vmatmul.f32.vlgmr.msra.gmra.mxu3 %v131_v40 }
 0x12d   :  { %v152_v42 = vpop.f32.mrf.mxu1 }
 0x12e   :  { %v153_v43 = vadd.f32 %v223_v41, %v152_v42 }
 0x130   :  { %v158_v44 = vadd.f32 %v153_v43, %v68_v29 }
 0x132   :  { %v160_v45 = vmax.f32 %v158_v44, 0.0 }
 0x134   :  { %162 = vst [vmem:[#allocation8] sm:$0xff] %v160_v45 }
 0x139   :  { %v155_v46 = vpop.f32.mrf.mxu3 }
 0x13a   :  { %v156_v47 = vadd.f32 %v223_v41, %v155_v46 }
 0x13c   :  { %v159_v48 = vadd.f32 %v156_v47, %v69_v28 }
 0x13e   :  { %v161_v49 = vmax.f32 %v159_v48, 0.0 }
 0x140   :  { %163 = vst [vmem:[#allocation8 + $0x8] sm:$0xff] %v161_v49 }
 0x141   :  { %176 = dma.vmem_to_hbm [thread:$0]  %s169_s11, 256, %s171_s14, [#allocation4], %s327_s26, %s327_s26, %s328_s27  }
 0x142   :  { %324 = dma.done.wait [#allocation4], 256  }
 0x143   :  { %325 = vsyncadd [#allocation4], 4294967040 }
 0x144   :  { %181 = vsyncpa [#allocation3], 1 }
 0x145   :  { %182 = vsyncpa [#allocation6], 1 }
 0x146   :  { %183 = vsyncpa [#allocation4], 1 }

</bundles_post_ra>
